<compile_context>
chip_gen: v5e
topology: v5e:2x2
jax: 0.10.0
libtpu: 0.0.40
codegen_flags: <defaults>
</compile_context>

<pallas_src>
import jax
import jax.numpy as jnp
from jax.experimental import pallas as pl
from jax.experimental.pallas import tpu as pltpu


def _drop_path_kernel(scale_ref, x_ref, o_ref):
    # scale_ref: (TN, 1)  f32 per-point scale (mask / keep_prob, precomputed)
    # x_ref    : (TN, TC) features (any float dtype)
    # o_ref    : (TN, TC) output, same dtype as x
    x = x_ref[...].astype(jnp.float32)
    s = scale_ref[...]                      # (TN, 1) broadcasts along lanes
    o_ref[...] = (x * s).astype(o_ref.dtype)


def _round_up(a, b):
    return (a + b - 1) // b * b


def _pick_col_tile(C):
    # Prefer lane-dense tiles (multiples of 128) that divide C; cap at 1024.
    if C % 128 == 0:
        for tc in (1024, 512, 256, 128):
            if tc <= C and C % tc == 0:
                return tc
    # Lane-sparse / ragged C: the only other legal block extent is the full
    # dim (callers should pad/fuse C to a multiple of 128 upstream for peak BW).
    return C


def minkowski_drop_path_kernel_call(x, point_scale):
    """x: (N, C) float features, point_scale: (N,) f32 per-point scale."""
    N, C = x.shape
    itemsize = jnp.dtype(x.dtype).itemsize
    tc = _pick_col_tile(C)

    # Row tile: target ~2 MiB per feature tile, bounded below by 8 rows and
    # above by the (8-rounded) row count; shrink if double-buffered
    # (x tile + out tile + scale tile) would exceed ~16 MiB of VMEM.
    target_tile_bytes = 2 * 1024 * 1024
    tn = (target_tile_bytes // max(1, tc * itemsize)) // 8 * 8
    tn = max(8, min(tn, _round_up(N, 8)))
    vmem_budget = 16 * 1024 * 1024
    while tn > 8 and 2 * (2 * tn * tc * itemsize + tn * 4) > vmem_budget:
        tn = max(8, (tn // 2) // 8 * 8)

    scale2d = point_scale.reshape(N, 1).astype(jnp.float32)

    out = pl.pallas_call(
        _drop_path_kernel,
        out_shape=jax.ShapeDtypeStruct((N, C), x.dtype),
        grid_spec=pltpu.PrefetchScalarGridSpec(
            num_scalar_prefetch=0,
            # cdiv grid: Pallas masks the partial last block's writes, so
            # ragged N needs no padding copy in HBM.
            grid=(pl.cdiv(N, tn), pl.cdiv(C, tc)),
            in_specs=[
                pl.BlockSpec((tn, 1), lambda i, j: (i, 0)),   # per-point scale
                pl.BlockSpec((tn, tc), lambda i, j: (i, j)),  # feature tile
            ],
            out_specs=pl.BlockSpec((tn, tc), lambda i, j: (i, j)),
        ),
        compiler_params=pltpu.CompilerParams(
            # Pure streaming kernel: both axes independent -> shards across the
            # two TensorCores on v7x, no-op on v5e/v6e.
            dimension_semantics=("parallel", "parallel"),
            # Explicit scoped-VMEM limit; tiles are budgeted well below it and
            # it is <= physical VMEM on v5e/v6e/v7x.
            vmem_limit_bytes=32 * 1024 * 1024,
        ),
        # TODO(synk): pass input_output_aliases={1: 0} when the caller donates
        # x (removes the extra N*C output allocation in a larger step).
    )(scale2d, x)
    return out


def minkowski_drop_path(x, batch_idx, num_samples, key, *,
                        drop_prob=0.0, scale_by_keep=True, training=True):
    """Mirrors MinkowskiDropPath.forward semantics.

    x          : (N, C) features (SparseTensor.F)
    batch_idx  : (N,)   sample id per point (stands in for decomposed_coordinates)
    num_samples: B, number of samples in the batch
    key        : PRNG key replacing numpy.random.uniform per sample
    """
    if drop_prob == 0.0 or not training:
        return x
    keep_prob = 1.0 - drop_prob
    # One uniform draw per sample: keep sample iff u > drop_prob.
    u = jax.random.uniform(key, (num_samples,), dtype=jnp.float32)
    mask = (u > drop_prob).astype(jnp.float32)            # (B,)
    if keep_prob > 0.0 and scale_by_keep:
        mask = mask / keep_prob
    # Precompute the per-point scale (tiny gather, done outside the kernel);
    # the kernel itself is a pure broadcast-multiply stream.
    point_scale = jnp.take(mask, batch_idx.astype(jnp.int32), axis=0)  # (N,)
    return minkowski_drop_path_kernel_call(x, point_scale)


def _reference(x, batch_idx, num_samples, key, drop_prob, scale_by_keep):
    keep_prob = 1.0 - drop_prob
    u = jax.random.uniform(key, (num_samples,), dtype=jnp.float32)
    mask = (u > drop_prob).astype(jnp.float32)
    if keep_prob > 0.0 and scale_by_keep:
        mask = mask / keep_prob
    scale = mask[batch_idx][:, None]
    return (x.astype(jnp.float32) * scale).astype(x.dtype)


if __name__ == "__main__":
    key = jax.random.PRNGKey(0)
    k_x, k_drop, k_x2 = jax.random.split(key, 3)
    drop_prob = 0.25
    scale_by_keep = True

    # Case 1: lane-dense channels, row count a multiple of 8.
    # B=4 samples, 256 points each -> N=1024, C=128.
    N, C, B = 1024, 128, 4
    x = jax.random.normal(k_x, (N, C), dtype=jnp.float32)
    batch_idx = jnp.repeat(jnp.arange(B, dtype=jnp.int32), N // B)

    out = minkowski_drop_path(
        x, batch_idx, B, k_drop,
        drop_prob=drop_prob, scale_by_keep=scale_by_keep, training=True)
    out = jax.block_until_ready(out)
    ref = _reference(x, batch_idx, B, k_drop, drop_prob, scale_by_keep)
    assert out.shape == x.shape and out.dtype == x.dtype
    assert jnp.allclose(out, ref, atol=1e-6, rtol=1e-6)

    # Case 2: ragged row count + lane-sparse C + bf16 (exercises the masked
    # partial-block path and the f32-compute / narrow-store path).
    N2, C2, B2 = 200, 32, 3
    x2 = jax.random.normal(k_x2, (N2, C2), dtype=jnp.bfloat16)
    batch_idx2 = jnp.concatenate([
        jnp.zeros((70,), jnp.int32),
        jnp.ones((60,), jnp.int32),
        jnp.full((70,), 2, jnp.int32),
    ])
    out2 = minkowski_drop_path(
        x2, batch_idx2, B2, k_drop,
        drop_prob=drop_prob, scale_by_keep=scale_by_keep, training=True)
    out2 = jax.block_until_ready(out2)
    ref2 = _reference(x2, batch_idx2, B2, k_drop, drop_prob, scale_by_keep)
    assert out2.shape == x2.shape and out2.dtype == x2.dtype
    assert jnp.allclose(out2.astype(jnp.float32), ref2.astype(jnp.float32),
                        atol=1e-2, rtol=1e-2)

    # Case 3: eval / drop_prob=0 fast path returns x unchanged.
    out3 = minkowski_drop_path(x, batch_idx, B, k_drop,
                               drop_prob=0.0, training=True)
    assert out3 is x

    print("KERNEL_OK")
</pallas_src>

<mosaic_0001>
module attributes {stable_mosaic.version = 11 : i64} {
  func.func @_drop_path_kernel(%arg0: i32, %arg1: i32, %arg2: memref<1024x1xf32, #tpu.memory_space<vmem>>, %arg3: memref<1024x128xf32, #tpu.memory_space<vmem>>, %arg4: memref<1024x128xf32, #tpu.memory_space<vmem>>) attributes {dimension_semantics = [#tpu.dimension_semantics<parallel>, #tpu.dimension_semantics<parallel>], iteration_bounds = array<i64: 1, 1>, scalar_prefetch = 0 : i64, scratch_operands = 0 : i64, tpu.core_type = #tpu.core_type<tc>, window_params = [{transform_indices = @transform_0, window_bounds = array<i64: 1024, 1>}, {transform_indices = @transform_1, window_bounds = array<i64: 1024, 128>}, {transform_indices = @transform_2, window_bounds = array<i64: 1024, 128>}]} {
    %c0 = arith.constant 0 : index
    %c0_0 = arith.constant 0 : index
    %0 = vector.load %arg3[%c0, %c0_0] : memref<1024x128xf32, #tpu.memory_space<vmem>>, vector<1024x128xf32>
    %c0_1 = arith.constant 0 : index
    %c0_2 = arith.constant 0 : index
    %1 = vector.load %arg2[%c0_1, %c0_2] : memref<1024x1xf32, #tpu.memory_space<vmem>>, vector<1024x1xf32>
    %2 = vector.broadcast %1 : vector<1024x1xf32> to vector<1024x128xf32>
    %3 = arith.mulf %0, %2 : vector<1024x128xf32>
    %c0_3 = arith.constant 0 : index
    %c0_4 = arith.constant 0 : index
    %4 = vector.load %arg4[%c0_3, %c0_4] : memref<1024x128xf32, #tpu.memory_space<vmem>>, vector<1024x128xf32>
    tpu.vector_store %arg4[%c0_3, %c0_4], %3 {strides = array<i32>} : memref<1024x128xf32, #tpu.memory_space<vmem>>, vector<1024x128xf32>,
    return
  }
  func.func @transform_0(%arg0: i32, %arg1: i32) -> (i32, i32) {
    %c0_i32 = arith.constant 0 : i32
    %c0_i32_0 = arith.constant 0 : i32
    return %arg0, %c0_i32 : i32, i32
  }
  func.func @transform_1(%arg0: i32, %arg1: i32) -> (i32, i32) {
    %c0_i32 = arith.constant 0 : i32
    return %arg0, %arg1 : i32, i32
  }
  func.func @transform_2(%arg0: i32, %arg1: i32) -> (i32, i32) {
    %c0_i32 = arith.constant 0 : i32
    return %arg0, %arg1 : i32, i32
  }
}

</mosaic_0001>

<bundles_post_ra>
// kernel: tpu_custom_call.1
= control target key start
LH: loop header
LB: loop body
LE: loop exit
PB: predicated region body
PF: predicated region fallthrough
CT: control target
= control target key end

     0   :  { %v1215_v3 = vmov 0   ;;  %s2005_s0 = inlined_call_operand.vmem [shape: f32[1024,1], index: 0, kind: input, shape index: {}]   ;;  %s2006_s1 = inlined_call_operand.vmem [shape: f32[1024,128], index: 1, kind: input, shape index: {}]   ;;  %s2007_s2 = inlined_call_operand.hbm [shape: f32[1024,128], index: 2, kind: output, shape index: {}]  }
   0x1   :  { %v144_v0 = vld [vmem:[%s2005_s0 + $0x20] sm:$0xff]  ;;  %v142_v1 = vld [vmem:[%s2005_s0 + $0x10] sm:$0xff]  ;;  %1188 = vset.pattern.permute.xlu2 %v1215_v3  ;;  %1187 = vset.pattern.permute.xlu1 %v1215_v3 }
   0x2   :  { %v140_v2 = vld [vmem:[%s2005_s0] sm:$0xff]  ;;  %1186 = vset.pattern.permute.xlu0 %v1215_v3  ;;  %290 = vperm.xlu2 %1188, %v144_v0  }
   0x3   :  { %280 = vperm.xlu1 %1187, %v142_v1   ;;  %270 = vperm.xlu0 %1186, %v140_v2  }
   0x4   :  { %7 = vsyncpa [#allocation3], 0  ;;  %v145_v4 = vld [vmem:[%s2005_s0 + $0x28] sm:$0xff]  ;;  %v143_v5 = vld [vmem:[%s2005_s0 + $0x18] sm:$0xff]  ;;  %s1216_s14 = smov [#allocation2]   ;;  %s1170_s18 = sshll.u32 %s2007_s2, 4  ;;  %s1171_s18 = int_to_ptr.hbm [resolvable:$true] %s1170_s18 }
   0x5   :  { %v141_v6 = vld [vmem:[%s2005_s0 + $0x8] sm:$0xff]  ;;  %v148_v7 = vld [vmem:[%s2005_s0 + $0x40] sm:$0xff]  ;;  %v147_v8 = vld [vmem:[%s2005_s0 + $0x38] sm:$0xff]  ;;  %s1168_s15 = sshll.u32 %s1216_s14, 4  ;;  %s1217_s19 = smov 128   ;;  %s1169_s15 = int_to_ptr.vmem [resolvable:$true] %s1168_s15 }
   0x6   :  { %v146_v9 = vld [vmem:[%s2005_s0 + $0x30] sm:$0xff]  ;;  %v151_v10 = vld [vmem:[%s2005_s0 + $0x58] sm:$0xff]  ;;  %v149_v12 = vld [vmem:[%s2005_s0 + $0x48] sm:$0xff]  ;;  %s1218_s20 = smov 8  }
   0x7   :  { %v150_v11 = vld [vmem:[%s2005_s0 + $0x50] sm:$0xff]  ;;  %v153_v14 = vld [vmem:[%s2005_s0 + $0x68] sm:$0xff]  ;;  %v152_v15 = vld [vmem:[%s2005_s0 + $0x60] sm:$0xff] }
   0x8   :  { %v154_v13 = vld [vmem:[%s2005_s0 + $0x70] sm:$0xff]  ;;  %v157_v16 = vld [vmem:[%s2005_s0 + $0x88] sm:$0xff]  ;;  %v156_v17 = vld [vmem:[%s2005_s0 + $0x80] sm:$0xff] }
   0x9   :  { %v155_v18 = vld [vmem:[%s2005_s0 + $0x78] sm:$0xff]  ;;  %v160_v19 = vld [vmem:[%s2005_s0 + $0xa0] sm:$0xff]  ;;  %v158_v21 = vld [vmem:[%s2005_s0 + $0x90] sm:$0xff] }
   0xa   :  { %295 = vperm.xlu2 %1188, %v145_v4   ;;  %v159_v20 = vld [vmem:[%s2005_s0 + $0x98] sm:$0xff]  ;;  %v162_v23 = vld [vmem:[%s2005_s0 + $0xb0] sm:$0xff]  ;;  %v161_v24 = vld [vmem:[%s2005_s0 + $0xa8] sm:$0xff] }
   0xb   :  { %285 = vperm.xlu1 %1187, %v143_v5   ;;  %275 = vperm.xlu0 %1186, %v141_v6   ;;  %v163_v22 = vld [vmem:[%s2005_s0 + $0xb8] sm:$0xff]  ;;  %v166_v25 = vld [vmem:[%s2005_s0 + $0xd0] sm:$0xff]  ;;  %v165_v26 = vld [vmem:[%s2005_s0 + $0xc8] sm:$0xff] }
   0xc   :  { %v164_v27 = vld [vmem:[%s2005_s0 + $0xc0] sm:$0xff]  ;;  %v169_v28 = vld [vmem:[%s2005_s0 + $0xe8] sm:$0xff]  ;;  %v167_v30 = vld [vmem:[%s2005_s0 + $0xd8] sm:$0xff] }
   0xd   :  { %v168_v29 = vld [vmem:[%s2005_s0 + $0xe0] sm:$0xff]  ;;  %v171_v32 = vld [vmem:[%s2005_s0 + $0xf8] sm:$0xff]  ;;  %v170_v33 = vld [vmem:[%s2005_s0 + $0xf0] sm:$0xff] }
   0xe   :  { %v172_v31 = vld [vmem:[%s2005_s0 + $0x100] sm:$0xff]  ;;  %v175_v34 = vld [vmem:[%s2005_s0 + $0x118] sm:$0xff]  ;;  %v174_v35 = vld [vmem:[%s2005_s0 + $0x110] sm:$0xff] }
   0xf   :  { %v173_v36 = vld [vmem:[%s2005_s0 + $0x108] sm:$0xff]  ;;  %v16_v37 = vld [vmem:[%s2006_s1 + $0x20] sm:$0xff]  ;;  %v178_v40 = vld [vmem:[%s2005_s0 + $0x130] sm:$0xff] }
  0x10   :  { %v177_v41 = vld [vmem:[%s2005_s0 + $0x128] sm:$0xff]  ;;  %v176_v42 = vld [vmem:[%s2005_s0 + $0x120] sm:$0xff]  ;;  %v179_v48 = vld [vmem:[%s2005_s0 + $0x138] sm:$0xff] }
  0x11   :  { %v17_v43 = vld [vmem:[%s2006_s1 + $0x28] sm:$0xff]  ;;  %v180_v47 = vld [vmem:[%s2005_s0 + $0x140] sm:$0xff]  ;;  %v183_v53 = vld [vmem:[%s2005_s0 + $0x158] sm:$0xff] }
  0x12   :  { %310 = vperm.xlu2 %1188, %v148_v7   ;;  %v181_v46 = vld [vmem:[%s2005_s0 + $0x148] sm:$0xff]  ;;  %v20_v49 = vld [vmem:[%s2006_s1 + $0x40] sm:$0xff]  ;;  %v182_v54 = vld [vmem:[%s2005_s0 + $0x150] sm:$0xff] }
  0x13   :  { %305 = vperm.xlu1 %1187, %v147_v8   ;;  %300 = vperm.xlu0 %1186, %v146_v9   ;;  %v184_v52 = vld [vmem:[%s2005_s0 + $0x160] sm:$0xff]  ;;  %v23_v55 = vld [vmem:[%s2006_s1 + $0x58] sm:$0xff]  ;;  %v14_v56 = vld [vmem:[%s2006_s1 + $0x10] sm:$0xff] }
  0x14   :  { %v12_v57 = vld [vmem:[%s2006_s1] sm:$0xff]  ;;  %v187_v0 = vld [vmem:[%s2005_s0 + $0x178] sm:$0xff]  ;;  %v186_v1 = vld [vmem:[%s2005_s0 + $0x170] sm:$0xff] }
  0x15   :  { %v185_v2 = vld [vmem:[%s2005_s0 + $0x168] sm:$0xff]  ;;  %v26_v3 = vld [vmem:[%s2006_s1 + $0x70] sm:$0xff]  ;;  %v15_v4 = vld [vmem:[%s2006_s1 + $0x18] sm:$0xff] }
  0x16   :  { %v13_v5 = vld [vmem:[%s2006_s1 + $0x8] sm:$0xff] }
  0x1a   :  { %325 = vperm.xlu2 %1188, %v151_v10  }
  0x1b   :  { %320 = vperm.xlu1 %1187, %v150_v11   ;;  %315 = vperm.xlu0 %1186, %v149_v12   ;;  %v190_v12 = vld [vmem:[%s2005_s0 + $0x190] sm:$0xff] }
  0x22   :  { %340 = vperm.xlu2 %1188, %v154_v13   ;;  %v189_v13 = vld [vmem:[%s2005_s0 + $0x188] sm:$0xff] }
  0x23   :  { %335 = vperm.xlu1 %1187, %v153_v14   ;;  %330 = vperm.xlu0 %1186, %v152_v15   ;;  %v188_v14 = vld [vmem:[%s2005_s0 + $0x180] sm:$0xff]  ;;  %v29_v15 = vld [vmem:[%s2006_s1 + $0x88] sm:$0xff] }
  0x2a   :  { %355 = vperm.xlu2 %1188, %v157_v16   ;;  %v19_v16 = vld [vmem:[%s2006_s1 + $0x38] sm:$0xff] }
  0x2b   :  { %350 = vperm.xlu1 %1187, %v156_v17   ;;  %345 = vperm.xlu0 %1186, %v155_v18   ;;  %v18_v17 = vld [vmem:[%s2006_s1 + $0x30] sm:$0xff] }
  0x32   :  { %370 = vperm.xlu2 %1188, %v160_v19  }
  0x33   :  { %365 = vperm.xlu1 %1187, %v159_v20   ;;  %360 = vperm.xlu0 %1186, %v158_v21  }
  0x3a   :  { %385 = vperm.xlu2 %1188, %v163_v22  }
  0x3b   :  { %380 = vperm.xlu1 %1187, %v162_v23   ;;  %375 = vperm.xlu0 %1186, %v161_v24   ;;  %v193_v24 = vld [vmem:[%s2005_s0 + $0x1a8] sm:$0xff] }
  0x42   :  { %400 = vperm.xlu2 %1188, %v166_v25   ;;  %v192_v25 = vld [vmem:[%s2005_s0 + $0x1a0] sm:$0xff] }
  0x43   :  { %395 = vperm.xlu1 %1187, %v165_v26   ;;  %390 = vperm.xlu0 %1186, %v164_v27   ;;  %v191_v26 = vld [vmem:[%s2005_s0 + $0x198] sm:$0xff]  ;;  %v32_v27 = vld [vmem:[%s2006_s1 + $0xa0] sm:$0xff] }
  0x4a   :  { %415 = vperm.xlu2 %1188, %v169_v28   ;;  %v22_v28 = vld [vmem:[%s2006_s1 + $0x50] sm:$0xff] }
  0x4b   :  { %410 = vperm.xlu1 %1187, %v168_v29   ;;  %405 = vperm.xlu0 %1186, %v167_v30   ;;  %v21_v29 = vld [vmem:[%s2006_s1 + $0x48] sm:$0xff] }
  0x52   :  { %430 = vperm.xlu2 %1188, %v172_v31  }
  0x53   :  { %425 = vperm.xlu1 %1187, %v171_v32   ;;  %420 = vperm.xlu0 %1186, %v170_v33  }
  0x5a   :  { %445 = vperm.xlu2 %1188, %v175_v34  }
  0x5b   :  { %440 = vperm.xlu1 %1187, %v174_v35   ;;  %435 = vperm.xlu0 %1186, %v173_v36   ;;  %v196_v36 = vld [vmem:[%s2005_s0 + $0x1c0] sm:$0xff] }
  0x5c   :  { %v291_v38 = vpop.permute.xlu2 %290 }
  0x5d   :  { %v912_v39 = vmul.f32 %v291_v38, %v16_v37  ;;  %v195_v37 = vld [vmem:[%s2005_s0 + $0x1b8] sm:$0xff]  ;;  %v194_v38 = vld [vmem:[%s2005_s0 + $0x1b0] sm:$0xff] }
  0x5f   :  { %1040 = vst [vmem:[#allocation2 + $0x20] sm:$0xff] %v912_v39  ;;  %v35_v39 = vld [vmem:[%s2006_s1 + $0xb8] sm:$0xff] }
  0x62   :  { %460 = vperm.xlu2 %1188, %v178_v40   ;;  %v25_v40 = vld [vmem:[%s2006_s1 + $0x68] sm:$0xff] }
  0x63   :  { %455 = vperm.xlu1 %1187, %v177_v41   ;;  %450 = vperm.xlu0 %1186, %v176_v42   ;;  %v24_v41 = vld [vmem:[%s2006_s1 + $0x60] sm:$0xff] }
  0x64   :  { %v296_v44 = vpop.permute.xlu2 %295 }
  0x65   :  { %v913_v45 = vmul.f32 %v296_v44, %v17_v43 }
  0x67   :  { %1041 = vst [vmem:[#allocation2 + $0x28] sm:$0xff] %v913_v45 }
  0x6a   :  { %475 = vperm.xlu2 %1188, %v181_v46  }
  0x6b   :  { %470 = vperm.xlu1 %1187, %v180_v47   ;;  %465 = vperm.xlu0 %1186, %v179_v48   ;;  %v199_v48 = vld [vmem:[%s2005_s0 + $0x1d8] sm:$0xff] }
  0x6c   :  { %v311_v50 = vpop.permute.xlu2 %310 }
  0x6d   :  { %v916_v51 = vmul.f32 %v311_v50, %v20_v49  ;;  %v198_v49 = vld [vmem:[%s2005_s0 + $0x1d0] sm:$0xff]  ;;  %v197_v50 = vld [vmem:[%s2005_s0 + $0x1c8] sm:$0xff] }
  0x6f   :  { %1044 = vst [vmem:[#allocation2 + $0x40] sm:$0xff] %v916_v51  ;;  %v38_v51 = vld [vmem:[%s2006_s1 + $0xd0] sm:$0xff] }
  0x72   :  { %490 = vperm.xlu2 %1188, %v184_v52   ;;  %v28_v52 = vld [vmem:[%s2006_s1 + $0x80] sm:$0xff] }
  0x73   :  { %485 = vperm.xlu1 %1187, %v183_v53   ;;  %480 = vperm.xlu0 %1186, %v182_v54   ;;  %v27_v53 = vld [vmem:[%s2006_s1 + $0x78] sm:$0xff] }
  0x74   :  { %v326_v58 = vpop.permute.xlu2 %325 }
  0x75   :  { %v919_v59 = vmul.f32 %v326_v58, %v23_v55  ;;  %v281_v60 = vpop.permute.xlu1 %280  ;;  %v271_v61 = vpop.permute.xlu0 %270 }
  0x76   :  { %v910_v62 = vmul.f32 %v281_v60, %v14_v56  ;;  %v908_v63 = vmul.f32 %v271_v61, %v12_v57  ;;  %v202_v60 = vld [vmem:[%s2005_s0 + $0x1f0] sm:$0xff]  ;;  %v201_v61 = vld [vmem:[%s2005_s0 + $0x1e8] sm:$0xff] }
  0x77   :  { %1047 = vst [vmem:[#allocation2 + $0x58] sm:$0xff] %v919_v59 }
  0x78   :  { %1038 = vst [vmem:[#allocation2 + $0x10] sm:$0xff] %v910_v62  ;;  %v200_v62 = vld [vmem:[%s2005_s0 + $0x1e0] sm:$0xff] }
  0x79   :  { %1036 = vst [vmem:[#allocation2] sm:$0xff] %v908_v63  ;;  %v41_v63 = vld [vmem:[%s2006_s1 + $0xe8] sm:$0xff] }
  0x7a   :  { %505 = vperm.xlu2 %1188, %v187_v0   ;;  %v31_v0 = vld [vmem:[%s2006_s1 + $0x98] sm:$0xff] }
  0x7b   :  { %500 = vperm.xlu1 %1187, %v186_v1   ;;  %495 = vperm.xlu0 %1186, %v185_v2   ;;  %v30_v1 = vld [vmem:[%s2006_s1 + $0x90] sm:$0xff] }
  0x7c   :  { %v341_v6 = vpop.permute.xlu2 %340 }
  0x7d   :  { %v922_v7 = vmul.f32 %v341_v6, %v26_v3  ;;  %v286_v8 = vpop.permute.xlu1 %285  ;;  %v276_v9 = vpop.permute.xlu0 %275 }
  0x7e   :  { %v911_v10 = vmul.f32 %v286_v8, %v15_v4  ;;  %v909_v11 = vmul.f32 %v276_v9, %v13_v5  ;;  %v205_v8 = vld [vmem:[%s2005_s0 + $0x208] sm:$0xff]  ;;  %v204_v9 = vld [vmem:[%s2005_s0 + $0x200] sm:$0xff] }
  0x7f   :  { %1050 = vst [vmem:[#allocation2 + $0x70] sm:$0xff] %v922_v7 }
  0x80   :  { %1039 = vst [vmem:[#allocation2 + $0x18] sm:$0xff] %v911_v10  ;;  %v203_v10 = vld [vmem:[%s2005_s0 + $0x1f8] sm:$0xff] }
  0x81   :  { %1037 = vst [vmem:[#allocation2 + $0x8] sm:$0xff] %v909_v11  ;;  %v44_v11 = vld [vmem:[%s2006_s1 + $0x100] sm:$0xff] }
  0x82   :  { %520 = vperm.xlu2 %1188, %v190_v12   ;;  %v34_v12 = vld [vmem:[%s2006_s1 + $0xb0] sm:$0xff] }
  0x83   :  { %515 = vperm.xlu1 %1187, %v189_v13   ;;  %510 = vperm.xlu0 %1186, %v188_v14   ;;  %v33_v13 = vld [vmem:[%s2006_s1 + $0xa8] sm:$0xff] }
  0x84   :  { %v356_v18 = vpop.permute.xlu2 %355 }
  0x85   :  { %v925_v19 = vmul.f32 %v356_v18, %v29_v15  ;;  %v306_v20 = vpop.permute.xlu1 %305  ;;  %v301_v21 = vpop.permute.xlu0 %300 }
  0x86   :  { %v915_v22 = vmul.f32 %v306_v20, %v19_v16  ;;  %v914_v23 = vmul.f32 %v301_v21, %v18_v17  ;;  %v208_v20 = vld [vmem:[%s2005_s0 + $0x220] sm:$0xff]  ;;  %v207_v21 = vld [vmem:[%s2005_s0 + $0x218] sm:$0xff] }
  0x87   :  { %1053 = vst [vmem:[#allocation2 + $0x88] sm:$0xff] %v925_v19 }
  0x88   :  { %1043 = vst [vmem:[#allocation2 + $0x38] sm:$0xff] %v915_v22  ;;  %v206_v22 = vld [vmem:[%s2005_s0 + $0x210] sm:$0xff] }
  0x89   :  { %1042 = vst [vmem:[#allocation2 + $0x30] sm:$0xff] %v914_v23  ;;  %v47_v23 = vld [vmem:[%s2006_s1 + $0x118] sm:$0xff] }
  0x8a   :  { %535 = vperm.xlu2 %1188, %v193_v24   ;;  %v37_v24 = vld [vmem:[%s2006_s1 + $0xc8] sm:$0xff] }
  0x8b   :  { %530 = vperm.xlu1 %1187, %v192_v25   ;;  %525 = vperm.xlu0 %1186, %v191_v26   ;;  %v36_v25 = vld [vmem:[%s2006_s1 + $0xc0] sm:$0xff] }
  0x8c   :  { %v371_v30 = vpop.permute.xlu2 %370 }
  0x8d   :  { %v928_v31 = vmul.f32 %v371_v30, %v32_v27  ;;  %v321_v32 = vpop.permute.xlu1 %320  ;;  %v316_v33 = vpop.permute.xlu0 %315 }
  0x8e   :  { %v918_v34 = vmul.f32 %v321_v32, %v22_v28  ;;  %v917_v35 = vmul.f32 %v316_v33, %v21_v29  ;;  %v211_v32 = vld [vmem:[%s2005_s0 + $0x238] sm:$0xff]  ;;  %v210_v33 = vld [vmem:[%s2005_s0 + $0x230] sm:$0xff] }
  0x8f   :  { %1056 = vst [vmem:[#allocation2 + $0xa0] sm:$0xff] %v928_v31 }
  0x90   :  { %1046 = vst [vmem:[#allocation2 + $0x50] sm:$0xff] %v918_v34  ;;  %v209_v34 = vld [vmem:[%s2005_s0 + $0x228] sm:$0xff] }
  0x91   :  { %1045 = vst [vmem:[#allocation2 + $0x48] sm:$0xff] %v917_v35  ;;  %v50_v35 = vld [vmem:[%s2006_s1 + $0x130] sm:$0xff] }
  0x92   :  { %550 = vperm.xlu2 %1188, %v196_v36   ;;  %v40_v36 = vld [vmem:[%s2006_s1 + $0xe0] sm:$0xff] }
  0x93   :  { %545 = vperm.xlu1 %1187, %v195_v37   ;;  %540 = vperm.xlu0 %1186, %v194_v38   ;;  %v39_v37 = vld [vmem:[%s2006_s1 + $0xd8] sm:$0xff] }
  0x94   :  { %v386_v42 = vpop.permute.xlu2 %385 }
  0x95   :  { %v931_v43 = vmul.f32 %v386_v42, %v35_v39  ;;  %v336_v44 = vpop.permute.xlu1 %335  ;;  %v331_v45 = vpop.permute.xlu0 %330 }
  0x96   :  { %v921_v46 = vmul.f32 %v336_v44, %v25_v40  ;;  %v920_v47 = vmul.f32 %v331_v45, %v24_v41  ;;  %v214_v44 = vld [vmem:[%s2005_s0 + $0x250] sm:$0xff]  ;;  %v213_v45 = vld [vmem:[%s2005_s0 + $0x248] sm:$0xff] }
  0x97   :  { %1059 = vst [vmem:[#allocation2 + $0xb8] sm:$0xff] %v931_v43 }
  0x98   :  { %1049 = vst [vmem:[#allocation2 + $0x68] sm:$0xff] %v921_v46  ;;  %v212_v46 = vld [vmem:[%s2005_s0 + $0x240] sm:$0xff] }
  0x99   :  { %1048 = vst [vmem:[#allocation2 + $0x60] sm:$0xff] %v920_v47  ;;  %v53_v47 = vld [vmem:[%s2006_s1 + $0x148] sm:$0xff] }
  0x9a   :  { %565 = vperm.xlu2 %1188, %v199_v48   ;;  %v43_v48 = vld [vmem:[%s2006_s1 + $0xf8] sm:$0xff] }
  0x9b   :  { %560 = vperm.xlu1 %1187, %v198_v49   ;;  %555 = vperm.xlu0 %1186, %v197_v50   ;;  %v42_v49 = vld [vmem:[%s2006_s1 + $0xf0] sm:$0xff] }
  0x9c   :  { %v401_v54 = vpop.permute.xlu2 %400 }
  0x9d   :  { %v934_v55 = vmul.f32 %v401_v54, %v38_v51  ;;  %v351_v56 = vpop.permute.xlu1 %350  ;;  %v346_v57 = vpop.permute.xlu0 %345 }
  0x9e   :  { %v924_v58 = vmul.f32 %v351_v56, %v28_v52  ;;  %v923_v59 = vmul.f32 %v346_v57, %v27_v53  ;;  %v217_v56 = vld [vmem:[%s2005_s0 + $0x268] sm:$0xff]  ;;  %v216_v57 = vld [vmem:[%s2005_s0 + $0x260] sm:$0xff] }
  0x9f   :  { %1062 = vst [vmem:[#allocation2 + $0xd0] sm:$0xff] %v934_v55 }
  0xa0   :  { %1052 = vst [vmem:[#allocation2 + $0x80] sm:$0xff] %v924_v58  ;;  %v215_v58 = vld [vmem:[%s2005_s0 + $0x258] sm:$0xff] }
  0xa1   :  { %1051 = vst [vmem:[#allocation2 + $0x78] sm:$0xff] %v923_v59  ;;  %v56_v59 = vld [vmem:[%s2006_s1 + $0x160] sm:$0xff] }
  0xa2   :  { %580 = vperm.xlu2 %1188, %v202_v60   ;;  %v46_v60 = vld [vmem:[%s2006_s1 + $0x110] sm:$0xff] }
  0xa3   :  { %575 = vperm.xlu1 %1187, %v201_v61   ;;  %570 = vperm.xlu0 %1186, %v200_v62   ;;  %v45_v61 = vld [vmem:[%s2006_s1 + $0x108] sm:$0xff] }
  0xa4   :  { %v416_v2 = vpop.permute.xlu2 %415 }
  0xa5   :  { %v937_v3 = vmul.f32 %v416_v2, %v41_v63  ;;  %v366_v4 = vpop.permute.xlu1 %365  ;;  %v361_v5 = vpop.permute.xlu0 %360 }
  0xa6   :  { %v927_v6 = vmul.f32 %v366_v4, %v31_v0  ;;  %v926_v7 = vmul.f32 %v361_v5, %v30_v1  ;;  %v220_v4 = vld [vmem:[%s2005_s0 + $0x280] sm:$0xff]  ;;  %v219_v5 = vld [vmem:[%s2005_s0 + $0x278] sm:$0xff] }
  0xa7   :  { %1065 = vst [vmem:[#allocation2 + $0xe8] sm:$0xff] %v937_v3 }
  0xa8   :  { %1055 = vst [vmem:[#allocation2 + $0x98] sm:$0xff] %v927_v6  ;;  %v218_v6 = vld [vmem:[%s2005_s0 + $0x270] sm:$0xff] }
  0xa9   :  { %1054 = vst [vmem:[#allocation2 + $0x90] sm:$0xff] %v926_v7  ;;  %v59_v7 = vld [vmem:[%s2006_s1 + $0x178] sm:$0xff] }
  0xaa   :  { %595 = vperm.xlu2 %1188, %v205_v8   ;;  %v49_v8 = vld [vmem:[%s2006_s1 + $0x128] sm:$0xff] }
  0xab   :  { %590 = vperm.xlu1 %1187, %v204_v9   ;;  %585 = vperm.xlu0 %1186, %v203_v10   ;;  %v48_v9 = vld [vmem:[%s2006_s1 + $0x120] sm:$0xff] }
  0xac   :  { %v431_v14 = vpop.permute.xlu2 %430 }
  0xad   :  { %v940_v15 = vmul.f32 %v431_v14, %v44_v11  ;;  %v381_v16 = vpop.permute.xlu1 %380  ;;  %v376_v17 = vpop.permute.xlu0 %375 }
  0xae   :  { %v930_v18 = vmul.f32 %v381_v16, %v34_v12  ;;  %v929_v19 = vmul.f32 %v376_v17, %v33_v13  ;;  %v223_v16 = vld [vmem:[%s2005_s0 + $0x298] sm:$0xff]  ;;  %v222_v17 = vld [vmem:[%s2005_s0 + $0x290] sm:$0xff] }
  0xaf   :  { %1068 = vst [vmem:[#allocation2 + $0x100] sm:$0xff] %v940_v15 }
  0xb0   :  { %1058 = vst [vmem:[#allocation2 + $0xb0] sm:$0xff] %v930_v18  ;;  %v221_v18 = vld [vmem:[%s2005_s0 + $0x288] sm:$0xff] }
  0xb1   :  { %1057 = vst [vmem:[#allocation2 + $0xa8] sm:$0xff] %v929_v19  ;;  %v62_v19 = vld [vmem:[%s2006_s1 + $0x190] sm:$0xff] }
  0xb2   :  { %610 = vperm.xlu2 %1188, %v208_v20   ;;  %v52_v20 = vld [vmem:[%s2006_s1 + $0x140] sm:$0xff] }
  0xb3   :  { %605 = vperm.xlu1 %1187, %v207_v21   ;;  %600 = vperm.xlu0 %1186, %v206_v22   ;;  %v51_v21 = vld [vmem:[%s2006_s1 + $0x138] sm:$0xff] }
  0xb4   :  { %v446_v26 = vpop.permute.xlu2 %445 }
  0xb5   :  { %v943_v27 = vmul.f32 %v446_v26, %v47_v23  ;;  %v396_v28 = vpop.permute.xlu1 %395  ;;  %v391_v29 = vpop.permute.xlu0 %390 }
  0xb6   :  { %v933_v30 = vmul.f32 %v396_v28, %v37_v24  ;;  %v932_v31 = vmul.f32 %v391_v29, %v36_v25  ;;  %v226_v28 = vld [vmem:[%s2005_s0 + $0x2b0] sm:$0xff]  ;;  %v225_v29 = vld [vmem:[%s2005_s0 + $0x2a8] sm:$0xff] }
  0xb7   :  { %1071 = vst [vmem:[#allocation2 + $0x118] sm:$0xff] %v943_v27 }
  0xb8   :  { %1061 = vst [vmem:[#allocation2 + $0xc8] sm:$0xff] %v933_v30  ;;  %v224_v30 = vld [vmem:[%s2005_s0 + $0x2a0] sm:$0xff] }
  0xb9   :  { %1060 = vst [vmem:[#allocation2 + $0xc0] sm:$0xff] %v932_v31  ;;  %v65_v31 = vld [vmem:[%s2006_s1 + $0x1a8] sm:$0xff] }
  0xba   :  { %625 = vperm.xlu2 %1188, %v211_v32   ;;  %v55_v32 = vld [vmem:[%s2006_s1 + $0x158] sm:$0xff] }
  0xbb   :  { %620 = vperm.xlu1 %1187, %v210_v33   ;;  %615 = vperm.xlu0 %1186, %v209_v34   ;;  %v54_v33 = vld [vmem:[%s2006_s1 + $0x150] sm:$0xff] }
  0xbc   :  { %v461_v38 = vpop.permute.xlu2 %460 }
  0xbd   :  { %v946_v39 = vmul.f32 %v461_v38, %v50_v35  ;;  %v411_v40 = vpop.permute.xlu1 %410  ;;  %v406_v41 = vpop.permute.xlu0 %405 }
  0xbe   :  { %v936_v42 = vmul.f32 %v411_v40, %v40_v36  ;;  %v935_v43 = vmul.f32 %v406_v41, %v39_v37  ;;  %v229_v40 = vld [vmem:[%s2005_s0 + $0x2c8] sm:$0xff]  ;;  %v228_v41 = vld [vmem:[%s2005_s0 + $0x2c0] sm:$0xff] }
  0xbf   :  { %1074 = vst [vmem:[#allocation2 + $0x130] sm:$0xff] %v946_v39 }
  0xc0   :  { %1064 = vst [vmem:[#allocation2 + $0xe0] sm:$0xff] %v936_v42  ;;  %v227_v42 = vld [vmem:[%s2005_s0 + $0x2b8] sm:$0xff] }
  0xc1   :  { %1063 = vst [vmem:[#allocation2 + $0xd8] sm:$0xff] %v935_v43  ;;  %v68_v43 = vld [vmem:[%s2006_s1 + $0x1c0] sm:$0xff] }
  0xc2   :  { %640 = vperm.xlu2 %1188, %v214_v44   ;;  %v58_v44 = vld [vmem:[%s2006_s1 + $0x170] sm:$0xff] }
  0xc3   :  { %635 = vperm.xlu1 %1187, %v213_v45   ;;  %630 = vperm.xlu0 %1186, %v212_v46   ;;  %v57_v45 = vld [vmem:[%s2006_s1 + $0x168] sm:$0xff] }
  0xc4   :  { %v476_v50 = vpop.permute.xlu2 %475 }
  0xc5   :  { %v949_v51 = vmul.f32 %v476_v50, %v53_v47  ;;  %v426_v52 = vpop.permute.xlu1 %425  ;;  %v421_v53 = vpop.permute.xlu0 %420 }
  0xc6   :  { %v939_v54 = vmul.f32 %v426_v52, %v43_v48  ;;  %v938_v55 = vmul.f32 %v421_v53, %v42_v49  ;;  %v232_v52 = vld [vmem:[%s2005_s0 + $0x2e0] sm:$0xff]  ;;  %v231_v53 = vld [vmem:[%s2005_s0 + $0x2d8] sm:$0xff] }
  0xc7   :  { %1077 = vst [vmem:[#allocation2 + $0x148] sm:$0xff] %v949_v51 }
  0xc8   :  { %1067 = vst [vmem:[#allocation2 + $0xf8] sm:$0xff] %v939_v54  ;;  %v230_v54 = vld [vmem:[%s2005_s0 + $0x2d0] sm:$0xff] }
  0xc9   :  { %1066 = vst [vmem:[#allocation2 + $0xf0] sm:$0xff] %v938_v55  ;;  %v71_v55 = vld [vmem:[%s2006_s1 + $0x1d8] sm:$0xff] }
  0xca   :  { %655 = vperm.xlu2 %1188, %v217_v56   ;;  %v61_v56 = vld [vmem:[%s2006_s1 + $0x188] sm:$0xff] }
  0xcb   :  { %650 = vperm.xlu1 %1187, %v216_v57   ;;  %645 = vperm.xlu0 %1186, %v215_v58   ;;  %v60_v57 = vld [vmem:[%s2006_s1 + $0x180] sm:$0xff] }
  0xcc   :  { %v491_v62 = vpop.permute.xlu2 %490 }
  0xcd   :  { %v952_v63 = vmul.f32 %v491_v62, %v56_v59  ;;  %v441_v0 = vpop.permute.xlu1 %440  ;;  %v436_v1 = vpop.permute.xlu0 %435 }
  0xce   :  { %v942_v2 = vmul.f32 %v441_v0, %v46_v60  ;;  %v941_v3 = vmul.f32 %v436_v1, %v45_v61  ;;  %v235_v0 = vld [vmem:[%s2005_s0 + $0x2f8] sm:$0xff]  ;;  %v234_v1 = vld [vmem:[%s2005_s0 + $0x2f0] sm:$0xff] }
  0xcf   :  { %1080 = vst [vmem:[#allocation2 + $0x160] sm:$0xff] %v952_v63 }
  0xd0   :  { %1070 = vst [vmem:[#allocation2 + $0x110] sm:$0xff] %v942_v2  ;;  %v233_v2 = vld [vmem:[%s2005_s0 + $0x2e8] sm:$0xff] }
  0xd1   :  { %1069 = vst [vmem:[#allocation2 + $0x108] sm:$0xff] %v941_v3  ;;  %v74_v3 = vld [vmem:[%s2006_s1 + $0x1f0] sm:$0xff] }
  0xd2   :  { %670 = vperm.xlu2 %1188, %v220_v4   ;;  %v64_v4 = vld [vmem:[%s2006_s1 + $0x1a0] sm:$0xff] }
  0xd3   :  { %665 = vperm.xlu1 %1187, %v219_v5   ;;  %660 = vperm.xlu0 %1186, %v218_v6   ;;  %v63_v5 = vld [vmem:[%s2006_s1 + $0x198] sm:$0xff] }
  0xd4   :  { %v506_v10 = vpop.permute.xlu2 %505 }
  0xd5   :  { %v955_v11 = vmul.f32 %v506_v10, %v59_v7  ;;  %v456_v12 = vpop.permute.xlu1 %455  ;;  %v451_v13 = vpop.permute.xlu0 %450 }
  0xd6   :  { %v945_v14 = vmul.f32 %v456_v12, %v49_v8  ;;  %v944_v15 = vmul.f32 %v451_v13, %v48_v9  ;;  %v238_v12 = vld [vmem:[%s2005_s0 + $0x310] sm:$0xff]  ;;  %v237_v13 = vld [vmem:[%s2005_s0 + $0x308] sm:$0xff] }
  0xd7   :  { %1083 = vst [vmem:[#allocation2 + $0x178] sm:$0xff] %v955_v11 }
  0xd8   :  { %1073 = vst [vmem:[#allocation2 + $0x128] sm:$0xff] %v945_v14  ;;  %v236_v14 = vld [vmem:[%s2005_s0 + $0x300] sm:$0xff] }
  0xd9   :  { %1072 = vst [vmem:[#allocation2 + $0x120] sm:$0xff] %v944_v15  ;;  %v77_v15 = vld [vmem:[%s2006_s1 + $0x208] sm:$0xff] }
  0xda   :  { %685 = vperm.xlu2 %1188, %v223_v16   ;;  %v67_v16 = vld [vmem:[%s2006_s1 + $0x1b8] sm:$0xff] }
  0xdb   :  { %680 = vperm.xlu1 %1187, %v222_v17   ;;  %675 = vperm.xlu0 %1186, %v221_v18   ;;  %v66_v17 = vld [vmem:[%s2006_s1 + $0x1b0] sm:$0xff] }
  0xdc   :  { %v521_v22 = vpop.permute.xlu2 %520 }
  0xdd   :  { %v958_v23 = vmul.f32 %v521_v22, %v62_v19  ;;  %v471_v24 = vpop.permute.xlu1 %470  ;;  %v466_v25 = vpop.permute.xlu0 %465 }
  0xde   :  { %v948_v26 = vmul.f32 %v471_v24, %v52_v20  ;;  %v947_v27 = vmul.f32 %v466_v25, %v51_v21  ;;  %v241_v24 = vld [vmem:[%s2005_s0 + $0x328] sm:$0xff]  ;;  %v240_v25 = vld [vmem:[%s2005_s0 + $0x320] sm:$0xff] }
  0xdf   :  { %1086 = vst [vmem:[#allocation2 + $0x190] sm:$0xff] %v958_v23 }
  0xe0   :  { %1076 = vst [vmem:[#allocation2 + $0x140] sm:$0xff] %v948_v26  ;;  %v239_v26 = vld [vmem:[%s2005_s0 + $0x318] sm:$0xff] }
  0xe1   :  { %1075 = vst [vmem:[#allocation2 + $0x138] sm:$0xff] %v947_v27  ;;  %v80_v27 = vld [vmem:[%s2006_s1 + $0x220] sm:$0xff] }
  0xe2   :  { %700 = vperm.xlu2 %1188, %v226_v28   ;;  %v70_v28 = vld [vmem:[%s2006_s1 + $0x1d0] sm:$0xff] }
  0xe3   :  { %695 = vperm.xlu1 %1187, %v225_v29   ;;  %690 = vperm.xlu0 %1186, %v224_v30   ;;  %v69_v29 = vld [vmem:[%s2006_s1 + $0x1c8] sm:$0xff] }
  0xe4   :  { %v536_v34 = vpop.permute.xlu2 %535 }
  0xe5   :  { %v961_v35 = vmul.f32 %v536_v34, %v65_v31  ;;  %v486_v36 = vpop.permute.xlu1 %485  ;;  %v481_v37 = vpop.permute.xlu0 %480 }
  0xe6   :  { %v951_v38 = vmul.f32 %v486_v36, %v55_v32  ;;  %v950_v39 = vmul.f32 %v481_v37, %v54_v33  ;;  %v244_v36 = vld [vmem:[%s2005_s0 + $0x340] sm:$0xff]  ;;  %v243_v37 = vld [vmem:[%s2005_s0 + $0x338] sm:$0xff] }
  0xe7   :  { %1089 = vst [vmem:[#allocation2 + $0x1a8] sm:$0xff] %v961_v35 }
  0xe8   :  { %1079 = vst [vmem:[#allocation2 + $0x158] sm:$0xff] %v951_v38  ;;  %v242_v38 = vld [vmem:[%s2005_s0 + $0x330] sm:$0xff] }
  0xe9   :  { %1078 = vst [vmem:[#allocation2 + $0x150] sm:$0xff] %v950_v39  ;;  %v83_v39 = vld [vmem:[%s2006_s1 + $0x238] sm:$0xff] }
  0xea   :  { %715 = vperm.xlu2 %1188, %v229_v40   ;;  %v73_v40 = vld [vmem:[%s2006_s1 + $0x1e8] sm:$0xff] }
  0xeb   :  { %710 = vperm.xlu1 %1187, %v228_v41   ;;  %705 = vperm.xlu0 %1186, %v227_v42   ;;  %v72_v41 = vld [vmem:[%s2006_s1 + $0x1e0] sm:$0xff] }
  0xec   :  { %v551_v46 = vpop.permute.xlu2 %550 }
  0xed   :  { %v964_v47 = vmul.f32 %v551_v46, %v68_v43  ;;  %v501_v48 = vpop.permute.xlu1 %500  ;;  %v496_v49 = vpop.permute.xlu0 %495 }
  0xee   :  { %v954_v50 = vmul.f32 %v501_v48, %v58_v44  ;;  %v953_v51 = vmul.f32 %v496_v49, %v57_v45  ;;  %v247_v48 = vld [vmem:[%s2005_s0 + $0x358] sm:$0xff]  ;;  %v246_v49 = vld [vmem:[%s2005_s0 + $0x350] sm:$0xff] }
  0xef   :  { %1092 = vst [vmem:[#allocation2 + $0x1c0] sm:$0xff] %v964_v47 }
  0xf0   :  { %1082 = vst [vmem:[#allocation2 + $0x170] sm:$0xff] %v954_v50  ;;  %v245_v50 = vld [vmem:[%s2005_s0 + $0x348] sm:$0xff] }
  0xf1   :  { %1081 = vst [vmem:[#allocation2 + $0x168] sm:$0xff] %v953_v51  ;;  %v86_v51 = vld [vmem:[%s2006_s1 + $0x250] sm:$0xff] }
  0xf2   :  { %730 = vperm.xlu2 %1188, %v232_v52   ;;  %v76_v52 = vld [vmem:[%s2006_s1 + $0x200] sm:$0xff] }
  0xf3   :  { %725 = vperm.xlu1 %1187, %v231_v53   ;;  %720 = vperm.xlu0 %1186, %v230_v54   ;;  %v75_v53 = vld [vmem:[%s2006_s1 + $0x1f8] sm:$0xff] }
  0xf4   :  { %v566_v58 = vpop.permute.xlu2 %565 }
  0xf5   :  { %v967_v59 = vmul.f32 %v566_v58, %v71_v55  ;;  %v516_v60 = vpop.permute.xlu1 %515  ;;  %v511_v61 = vpop.permute.xlu0 %510 }
  0xf6   :  { %v957_v62 = vmul.f32 %v516_v60, %v61_v56  ;;  %v956_v63 = vmul.f32 %v511_v61, %v60_v57  ;;  %v250_v60 = vld [vmem:[%s2005_s0 + $0x370] sm:$0xff]  ;;  %v249_v61 = vld [vmem:[%s2005_s0 + $0x368] sm:$0xff] }
  0xf7   :  { %1095 = vst [vmem:[#allocation2 + $0x1d8] sm:$0xff] %v967_v59 }
  0xf8   :  { %1085 = vst [vmem:[#allocation2 + $0x188] sm:$0xff] %v957_v62  ;;  %v248_v62 = vld [vmem:[%s2005_s0 + $0x360] sm:$0xff] }
  0xf9   :  { %1084 = vst [vmem:[#allocation2 + $0x180] sm:$0xff] %v956_v63  ;;  %v89_v63 = vld [vmem:[%s2006_s1 + $0x268] sm:$0xff] }
  0xfa   :  { %745 = vperm.xlu2 %1188, %v235_v0   ;;  %v79_v0 = vld [vmem:[%s2006_s1 + $0x218] sm:$0xff] }
  0xfb   :  { %740 = vperm.xlu1 %1187, %v234_v1   ;;  %735 = vperm.xlu0 %1186, %v233_v2   ;;  %v78_v1 = vld [vmem:[%s2006_s1 + $0x210] sm:$0xff] }
  0xfc   :  { %v581_v6 = vpop.permute.xlu2 %580 }
  0xfd   :  { %v970_v7 = vmul.f32 %v581_v6, %v74_v3  ;;  %v531_v8 = vpop.permute.xlu1 %530  ;;  %v526_v9 = vpop.permute.xlu0 %525 }
  0xfe   :  { %v960_v10 = vmul.f32 %v531_v8, %v64_v4  ;;  %v959_v11 = vmul.f32 %v526_v9, %v63_v5  ;;  %v253_v8 = vld [vmem:[%s2005_s0 + $0x388] sm:$0xff]  ;;  %v252_v9 = vld [vmem:[%s2005_s0 + $0x380] sm:$0xff] }
  0xff   :  { %1098 = vst [vmem:[#allocation2 + $0x1f0] sm:$0xff] %v970_v7 }
 0x100   :  { %1088 = vst [vmem:[#allocation2 + $0x1a0] sm:$0xff] %v960_v10  ;;  %v251_v10 = vld [vmem:[%s2005_s0 + $0x378] sm:$0xff] }
 0x101   :  { %1087 = vst [vmem:[#allocation2 + $0x198] sm:$0xff] %v959_v11  ;;  %v92_v11 = vld [vmem:[%s2006_s1 + $0x280] sm:$0xff] }
 0x102   :  { %760 = vperm.xlu2 %1188, %v238_v12   ;;  %v82_v12 = vld [vmem:[%s2006_s1 + $0x230] sm:$0xff] }
 0x103   :  { %755 = vperm.xlu1 %1187, %v237_v13   ;;  %750 = vperm.xlu0 %1186, %v236_v14   ;;  %v81_v13 = vld [vmem:[%s2006_s1 + $0x228] sm:$0xff] }
 0x104   :  { %v596_v18 = vpop.permute.xlu2 %595 }
 0x105   :  { %v973_v19 = vmul.f32 %v596_v18, %v77_v15  ;;  %v546_v20 = vpop.permute.xlu1 %545  ;;  %v541_v21 = vpop.permute.xlu0 %540 }
 0x106   :  { %v963_v22 = vmul.f32 %v546_v20, %v67_v16  ;;  %v962_v23 = vmul.f32 %v541_v21, %v66_v17  ;;  %v256_v20 = vld [vmem:[%s2005_s0 + $0x3a0] sm:$0xff]  ;;  %v255_v21 = vld [vmem:[%s2005_s0 + $0x398] sm:$0xff] }
 0x107   :  { %1101 = vst [vmem:[#allocation2 + $0x208] sm:$0xff] %v973_v19 }
 0x108   :  { %1091 = vst [vmem:[#allocation2 + $0x1b8] sm:$0xff] %v963_v22  ;;  %v254_v22 = vld [vmem:[%s2005_s0 + $0x390] sm:$0xff] }
 0x109   :  { %1090 = vst [vmem:[#allocation2 + $0x1b0] sm:$0xff] %v962_v23  ;;  %v95_v23 = vld [vmem:[%s2006_s1 + $0x298] sm:$0xff] }
 0x10a   :  { %775 = vperm.xlu2 %1188, %v241_v24   ;;  %v85_v24 = vld [vmem:[%s2006_s1 + $0x248] sm:$0xff] }
 0x10b   :  { %770 = vperm.xlu1 %1187, %v240_v25   ;;  %765 = vperm.xlu0 %1186, %v239_v26   ;;  %v84_v25 = vld [vmem:[%s2006_s1 + $0x240] sm:$0xff] }
 0x10c   :  { %v611_v30 = vpop.permute.xlu2 %610 }
 0x10d   :  { %v976_v31 = vmul.f32 %v611_v30, %v80_v27  ;;  %v561_v32 = vpop.permute.xlu1 %560  ;;  %v556_v33 = vpop.permute.xlu0 %555 }
 0x10e   :  { %v966_v34 = vmul.f32 %v561_v32, %v70_v28  ;;  %v965_v35 = vmul.f32 %v556_v33, %v69_v29  ;;  %v259_v32 = vld [vmem:[%s2005_s0 + $0x3b8] sm:$0xff]  ;;  %v258_v33 = vld [vmem:[%s2005_s0 + $0x3b0] sm:$0xff] }
 0x10f   :  { %1104 = vst [vmem:[#allocation2 + $0x220] sm:$0xff] %v976_v31 }
 0x110   :  { %1094 = vst [vmem:[#allocation2 + $0x1d0] sm:$0xff] %v966_v34  ;;  %v257_v34 = vld [vmem:[%s2005_s0 + $0x3a8] sm:$0xff] }
 0x111   :  { %1093 = vst [vmem:[#allocation2 + $0x1c8] sm:$0xff] %v965_v35  ;;  %v98_v35 = vld [vmem:[%s2006_s1 + $0x2b0] sm:$0xff] }
 0x112   :  { %790 = vperm.xlu2 %1188, %v244_v36   ;;  %v88_v36 = vld [vmem:[%s2006_s1 + $0x260] sm:$0xff] }
 0x113   :  { %785 = vperm.xlu1 %1187, %v243_v37   ;;  %780 = vperm.xlu0 %1186, %v242_v38   ;;  %v87_v37 = vld [vmem:[%s2006_s1 + $0x258] sm:$0xff] }
 0x114   :  { %v626_v42 = vpop.permute.xlu2 %625 }
 0x115   :  { %v979_v43 = vmul.f32 %v626_v42, %v83_v39  ;;  %v576_v44 = vpop.permute.xlu1 %575  ;;  %v571_v45 = vpop.permute.xlu0 %570 }
 0x116   :  { %v969_v46 = vmul.f32 %v576_v44, %v73_v40  ;;  %v968_v47 = vmul.f32 %v571_v45, %v72_v41  ;;  %v262_v44 = vld [vmem:[%s2005_s0 + $0x3d0] sm:$0xff]  ;;  %v261_v45 = vld [vmem:[%s2005_s0 + $0x3c8] sm:$0xff] }
 0x117   :  { %1107 = vst [vmem:[#allocation2 + $0x238] sm:$0xff] %v979_v43 }
 0x118   :  { %1097 = vst [vmem:[#allocation2 + $0x1e8] sm:$0xff] %v969_v46  ;;  %v260_v46 = vld [vmem:[%s2005_s0 + $0x3c0] sm:$0xff] }
 0x119   :  { %1096 = vst [vmem:[#allocation2 + $0x1e0] sm:$0xff] %v968_v47  ;;  %v101_v47 = vld [vmem:[%s2006_s1 + $0x2c8] sm:$0xff] }
 0x11a   :  { %805 = vperm.xlu2 %1188, %v247_v48   ;;  %v91_v48 = vld [vmem:[%s2006_s1 + $0x278] sm:$0xff] }
 0x11b   :  { %800 = vperm.xlu1 %1187, %v246_v49   ;;  %795 = vperm.xlu0 %1186, %v245_v50   ;;  %v90_v49 = vld [vmem:[%s2006_s1 + $0x270] sm:$0xff] }
 0x11c   :  { %v641_v54 = vpop.permute.xlu2 %640 }
 0x11d   :  { %v982_v55 = vmul.f32 %v641_v54, %v86_v51  ;;  %v591_v56 = vpop.permute.xlu1 %590  ;;  %v586_v57 = vpop.permute.xlu0 %585 }
 0x11e   :  { %v972_v58 = vmul.f32 %v591_v56, %v76_v52  ;;  %v971_v59 = vmul.f32 %v586_v57, %v75_v53  ;;  %v265_v56 = vld [vmem:[%s2005_s0 + $0x3e8] sm:$0xff]  ;;  %v264_v57 = vld [vmem:[%s2005_s0 + $0x3e0] sm:$0xff] }
 0x11f   :  { %1110 = vst [vmem:[#allocation2 + $0x250] sm:$0xff] %v982_v55 }
 0x120   :  { %1100 = vst [vmem:[#allocation2 + $0x200] sm:$0xff] %v972_v58  ;;  %v263_v58 = vld [vmem:[%s2005_s0 + $0x3d8] sm:$0xff] }
 0x121   :  { %1099 = vst [vmem:[#allocation2 + $0x1f8] sm:$0xff] %v971_v59  ;;  %v104_v59 = vld [vmem:[%s2006_s1 + $0x2e0] sm:$0xff] }
 0x122   :  { %820 = vperm.xlu2 %1188, %v250_v60   ;;  %v94_v60 = vld [vmem:[%s2006_s1 + $0x290] sm:$0xff] }
 0x123   :  { %815 = vperm.xlu1 %1187, %v249_v61   ;;  %810 = vperm.xlu0 %1186, %v248_v62   ;;  %v93_v61 = vld [vmem:[%s2006_s1 + $0x288] sm:$0xff] }
 0x124   :  { %v656_v2 = vpop.permute.xlu2 %655 }
 0x125   :  { %v985_v3 = vmul.f32 %v656_v2, %v89_v63  ;;  %v606_v4 = vpop.permute.xlu1 %605  ;;  %v601_v5 = vpop.permute.xlu0 %600 }
 0x126   :  { %v975_v6 = vmul.f32 %v606_v4, %v79_v0  ;;  %v974_v7 = vmul.f32 %v601_v5, %v78_v1  ;;  %v267_v4 = vld [vmem:[%s2005_s0 + $0x3f8] sm:$0xff]  ;;  %v266_v5 = vld [vmem:[%s2005_s0 + $0x3f0] sm:$0xff] }
 0x127   :  { %1113 = vst [vmem:[#allocation2 + $0x268] sm:$0xff] %v985_v3 }
 0x128   :  { %1103 = vst [vmem:[#allocation2 + $0x218] sm:$0xff] %v975_v6  ;;  %v107_v6 = vld [vmem:[%s2006_s1 + $0x2f8] sm:$0xff] }
 0x129   :  { %1102 = vst [vmem:[#allocation2 + $0x210] sm:$0xff] %v974_v7  ;;  %v97_v7 = vld [vmem:[%s2006_s1 + $0x2a8] sm:$0xff] }
 0x12a   :  { %835 = vperm.xlu2 %1188, %v253_v8   ;;  %v96_v8 = vld [vmem:[%s2006_s1 + $0x2a0] sm:$0xff] }
 0x12b   :  { %830 = vperm.xlu1 %1187, %v252_v9   ;;  %825 = vperm.xlu0 %1186, %v251_v10  }
 0x12c   :  { %v671_v14 = vpop.permute.xlu2 %670 }
 0x12d   :  { %v988_v15 = vmul.f32 %v671_v14, %v92_v11  ;;  %v621_v16 = vpop.permute.xlu1 %620  ;;  %v616_v17 = vpop.permute.xlu0 %615 }
 0x12e   :  { %v978_v18 = vmul.f32 %v621_v16, %v82_v12  ;;  %v977_v19 = vmul.f32 %v616_v17, %v81_v13  ;;  %v100_v16 = vld [vmem:[%s2006_s1 + $0x2c0] sm:$0xff]  ;;  %v99_v17 = vld [vmem:[%s2006_s1 + $0x2b8] sm:$0xff] }
 0x12f   :  { %1116 = vst [vmem:[#allocation2 + $0x280] sm:$0xff] %v988_v15  ;;  %v110_v15 = vld [vmem:[%s2006_s1 + $0x310] sm:$0xff] }
 0x130   :  { %1106 = vst [vmem:[#allocation2 + $0x230] sm:$0xff] %v978_v18 }
 0x131   :  { %1105 = vst [vmem:[#allocation2 + $0x228] sm:$0xff] %v977_v19 }
 0x132   :  { %850 = vperm.xlu2 %1188, %v256_v20  }
 0x133   :  { %845 = vperm.xlu1 %1187, %v255_v21   ;;  %840 = vperm.xlu0 %1186, %v254_v22  }
 0x134   :  { %v686_v26 = vpop.permute.xlu2 %685 }
 0x135   :  { %v991_v27 = vmul.f32 %v686_v26, %v95_v23  ;;  %v636_v28 = vpop.permute.xlu1 %635  ;;  %v631_v29 = vpop.permute.xlu0 %630  ;;  %v102_v26 = vld [vmem:[%s2006_s1 + $0x2d0] sm:$0xff] }
 0x136   :  { %v981_v30 = vmul.f32 %v636_v28, %v85_v24  ;;  %v980_v31 = vmul.f32 %v631_v29, %v84_v25  ;;  %v113_v24 = vld [vmem:[%s2006_s1 + $0x328] sm:$0xff]  ;;  %v103_v25 = vld [vmem:[%s2006_s1 + $0x2d8] sm:$0xff] }
 0x137   :  { %1119 = vst [vmem:[#allocation2 + $0x298] sm:$0xff] %v991_v27 }
 0x138   :  { %1109 = vst [vmem:[#allocation2 + $0x248] sm:$0xff] %v981_v30 }
 0x139   :  { %1108 = vst [vmem:[#allocation2 + $0x240] sm:$0xff] %v980_v31 }
 0x13a   :  { %865 = vperm.xlu2 %1188, %v259_v32  }
 0x13b   :  { %860 = vperm.xlu1 %1187, %v258_v33   ;;  %855 = vperm.xlu0 %1186, %v257_v34   ;;  %v116_v33 = vld [vmem:[%s2006_s1 + $0x340] sm:$0xff]  ;;  %v106_v34 = vld [vmem:[%s2006_s1 + $0x2f0] sm:$0xff] }
 0x13c   :  { %v701_v38 = vpop.permute.xlu2 %700 }
 0x13d   :  { %v994_v39 = vmul.f32 %v701_v38, %v98_v35  ;;  %v651_v40 = vpop.permute.xlu1 %650  ;;  %v646_v41 = vpop.permute.xlu0 %645  ;;  %v105_v35 = vld [vmem:[%s2006_s1 + $0x2e8] sm:$0xff] }
 0x13e   :  { %v984_v42 = vmul.f32 %v651_v40, %v88_v36  ;;  %v983_v43 = vmul.f32 %v646_v41, %v87_v37 }
 0x13f   :  { %1122 = vst [vmem:[#allocation2 + $0x2b0] sm:$0xff] %v994_v39 }
 0x140   :  { %1112 = vst [vmem:[#allocation2 + $0x260] sm:$0xff] %v984_v42  ;;  %v119_v42 = vld [vmem:[%s2006_s1 + $0x358] sm:$0xff] }
 0x141   :  { %1111 = vst [vmem:[#allocation2 + $0x258] sm:$0xff] %v983_v43  ;;  %v109_v43 = vld [vmem:[%s2006_s1 + $0x308] sm:$0xff] }
 0x142   :  { %880 = vperm.xlu2 %1188, %v262_v44   ;;  %v108_v44 = vld [vmem:[%s2006_s1 + $0x300] sm:$0xff] }
 0x143   :  { %875 = vperm.xlu1 %1187, %v261_v45   ;;  %870 = vperm.xlu0 %1186, %v260_v46  }
 0x144   :  { %v716_v50 = vpop.permute.xlu2 %715 }
 0x145   :  { %v997_v51 = vmul.f32 %v716_v50, %v101_v47  ;;  %v666_v52 = vpop.permute.xlu1 %665  ;;  %v661_v53 = vpop.permute.xlu0 %660 }
 0x146   :  { %v987_v54 = vmul.f32 %v666_v52, %v91_v48  ;;  %v986_v55 = vmul.f32 %v661_v53, %v90_v49  ;;  %v112_v52 = vld [vmem:[%s2006_s1 + $0x320] sm:$0xff]  ;;  %v111_v53 = vld [vmem:[%s2006_s1 + $0x318] sm:$0xff] }
 0x147   :  { %1125 = vst [vmem:[#allocation2 + $0x2c8] sm:$0xff] %v997_v51  ;;  %v122_v51 = vld [vmem:[%s2006_s1 + $0x370] sm:$0xff] }
 0x148   :  { %1115 = vst [vmem:[#allocation2 + $0x278] sm:$0xff] %v987_v54 }
 0x149   :  { %1114 = vst [vmem:[#allocation2 + $0x270] sm:$0xff] %v986_v55 }
 0x14a   :  { %895 = vperm.xlu2 %1188, %v265_v56  }
 0x14b   :  { %890 = vperm.xlu1 %1187, %v264_v57   ;;  %885 = vperm.xlu0 %1186, %v263_v58  }
 0x14c   :  { %v731_v62 = vpop.permute.xlu2 %730 }
 0x14d   :  { %v1000_v63 = vmul.f32 %v731_v62, %v104_v59  ;;  %v681_v0 = vpop.permute.xlu1 %680  ;;  %v676_v1 = vpop.permute.xlu0 %675  ;;  %v114_v62 = vld [vmem:[%s2006_s1 + $0x330] sm:$0xff] }
 0x14e   :  { %v990_v2 = vmul.f32 %v681_v0, %v94_v60  ;;  %v989_v3 = vmul.f32 %v676_v1, %v93_v61  ;;  %v125_v60 = vld [vmem:[%s2006_s1 + $0x388] sm:$0xff]  ;;  %v115_v61 = vld [vmem:[%s2006_s1 + $0x338] sm:$0xff] }
 0x14f   :  { %1128 = vst [vmem:[#allocation2 + $0x2e0] sm:$0xff] %v1000_v63 }
 0x150   :  { %1118 = vst [vmem:[#allocation2 + $0x290] sm:$0xff] %v990_v2 }
 0x151   :  { %1117 = vst [vmem:[#allocation2 + $0x288] sm:$0xff] %v989_v3 }
 0x153   :  { %905 = vperm.xlu1 %1187, %v267_v4   ;;  %900 = vperm.xlu0 %1186, %v266_v5   ;;  %v128_v5 = vld [vmem:[%s2006_s1 + $0x3a0] sm:$0xff] }
 0x154   :  { %v746_v9 = vpop.permute.xlu2 %745 }
 0x155   :  { %v1003_v10 = vmul.f32 %v746_v9, %v107_v6  ;;  %v696_v11 = vpop.permute.xlu1 %695  ;;  %v691_v12 = vpop.permute.xlu0 %690  ;;  %v118_v6 = vld [vmem:[%s2006_s1 + $0x350] sm:$0xff] }
 0x156   :  { %v993_v13 = vmul.f32 %v696_v11, %v97_v7  ;;  %v992_v14 = vmul.f32 %v691_v12, %v96_v8  ;;  %v117_v7 = vld [vmem:[%s2006_s1 + $0x348] sm:$0xff] }
 0x157   :  { %1131 = vst [vmem:[#allocation2 + $0x2f8] sm:$0xff] %v1003_v10 }
 0x158   :  { %1121 = vst [vmem:[#allocation2 + $0x2a8] sm:$0xff] %v993_v13 }
 0x159   :  { %1120 = vst [vmem:[#allocation2 + $0x2a0] sm:$0xff] %v992_v14  ;;  %v131_v14 = vld [vmem:[%s2006_s1 + $0x3b8] sm:$0xff] }
 0x15c   :  { %v761_v18 = vpop.permute.xlu2 %760 }
 0x15d   :  { %v1006_v19 = vmul.f32 %v761_v18, %v110_v15  ;;  %v711_v20 = vpop.permute.xlu1 %710  ;;  %v706_v21 = vpop.permute.xlu0 %705  ;;  %v121_v15 = vld [vmem:[%s2006_s1 + $0x368] sm:$0xff] }
 0x15e   :  { %v996_v22 = vmul.f32 %v711_v20, %v100_v16  ;;  %v995_v23 = vmul.f32 %v706_v21, %v99_v17  ;;  %v120_v16 = vld [vmem:[%s2006_s1 + $0x360] sm:$0xff] }
 0x15f   :  { %1134 = vst [vmem:[#allocation2 + $0x310] sm:$0xff] %v1006_v19 }
 0x160   :  { %1124 = vst [vmem:[#allocation2 + $0x2c0] sm:$0xff] %v996_v22 }
 0x161   :  { %1123 = vst [vmem:[#allocation2 + $0x2b8] sm:$0xff] %v995_v23  ;;  %v134_v23 = vld [vmem:[%s2006_s1 + $0x3d0] sm:$0xff] }
 0x164   :  { %v776_v27 = vpop.permute.xlu2 %775 }
 0x165   :  { %v1009_v28 = vmul.f32 %v776_v27, %v113_v24  ;;  %v726_v29 = vpop.permute.xlu1 %725  ;;  %v721_v30 = vpop.permute.xlu0 %720  ;;  %v124_v24 = vld [vmem:[%s2006_s1 + $0x380] sm:$0xff] }
 0x166   :  { %v999_v31 = vmul.f32 %v726_v29, %v103_v25  ;;  %v998_v32 = vmul.f32 %v721_v30, %v102_v26  ;;  %v123_v25 = vld [vmem:[%s2006_s1 + $0x378] sm:$0xff] }
 0x167   :  { %1137 = vst [vmem:[#allocation2 + $0x328] sm:$0xff] %v1009_v28 }
 0x168   :  { %1127 = vst [vmem:[#allocation2 + $0x2d8] sm:$0xff] %v999_v31 }
 0x169   :  { %1126 = vst [vmem:[#allocation2 + $0x2d0] sm:$0xff] %v998_v32  ;;  %v137_v32 = vld [vmem:[%s2006_s1 + $0x3e8] sm:$0xff] }
 0x16c   :  { %v791_v36 = vpop.permute.xlu2 %790 }
 0x16d   :  { %v1012_v37 = vmul.f32 %v791_v36, %v116_v33  ;;  %v741_v38 = vpop.permute.xlu1 %740  ;;  %v736_v39 = vpop.permute.xlu0 %735  ;;  %v127_v33 = vld [vmem:[%s2006_s1 + $0x398] sm:$0xff] }
 0x16e   :  { %v1002_v40 = vmul.f32 %v741_v38, %v106_v34  ;;  %v1001_v41 = vmul.f32 %v736_v39, %v105_v35  ;;  %v126_v34 = vld [vmem:[%s2006_s1 + $0x390] sm:$0xff] }
 0x16f   :  { %1140 = vst [vmem:[#allocation2 + $0x340] sm:$0xff] %v1012_v37 }
 0x170   :  { %1130 = vst [vmem:[#allocation2 + $0x2f0] sm:$0xff] %v1002_v40 }
 0x171   :  { %1129 = vst [vmem:[#allocation2 + $0x2e8] sm:$0xff] %v1001_v41  ;;  %v130_v41 = vld [vmem:[%s2006_s1 + $0x3b0] sm:$0xff] }
 0x174   :  { %v806_v45 = vpop.permute.xlu2 %805 }
 0x175   :  { %v1015_v46 = vmul.f32 %v806_v45, %v119_v42  ;;  %v756_v47 = vpop.permute.xlu1 %755  ;;  %v751_v48 = vpop.permute.xlu0 %750  ;;  %v129_v42 = vld [vmem:[%s2006_s1 + $0x3a8] sm:$0xff] }
 0x176   :  { %v1005_v49 = vmul.f32 %v756_v47, %v109_v43  ;;  %v1004_v50 = vmul.f32 %v751_v48, %v108_v44  ;;  %v133_v47 = vld [vmem:[%s2006_s1 + $0x3c8] sm:$0xff]  ;;  %v132_v48 = vld [vmem:[%s2006_s1 + $0x3c0] sm:$0xff] }
 0x177   :  { %1143 = vst [vmem:[#allocation2 + $0x358] sm:$0xff] %v1015_v46 }
 0x178   :  { %1133 = vst [vmem:[#allocation2 + $0x308] sm:$0xff] %v1005_v49 }
 0x179   :  { %1132 = vst [vmem:[#allocation2 + $0x300] sm:$0xff] %v1004_v50 }
 0x17c   :  { %v821_v54 = vpop.permute.xlu2 %820 }
 0x17d   :  { %v1018_v55 = vmul.f32 %v821_v54, %v122_v51  ;;  %v771_v56 = vpop.permute.xlu1 %770  ;;  %v766_v57 = vpop.permute.xlu0 %765  ;;  %v135_v54 = vld [vmem:[%s2006_s1 + $0x3d8] sm:$0xff] }
 0x17e   :  { %v1008_v58 = vmul.f32 %v771_v56, %v112_v52  ;;  %v1007_v59 = vmul.f32 %v766_v57, %v111_v53  ;;  %v136_v53 = vld [vmem:[%s2006_s1 + $0x3e0] sm:$0xff] }
 0x17f   :  { %1146 = vst [vmem:[#allocation2 + $0x370] sm:$0xff] %v1018_v55 }
 0x180   :  { %1136 = vst [vmem:[#allocation2 + $0x320] sm:$0xff] %v1008_v58 }
 0x181   :  { %1135 = vst [vmem:[#allocation2 + $0x318] sm:$0xff] %v1007_v59  ;;  %v139_v59 = vld [vmem:[%s2006_s1 + $0x3f8] sm:$0xff] }
 0x184   :  { %v836_v63 = vpop.permute.xlu2 %835 }
 0x185   :  { %v1021_v0 = vmul.f32 %v836_v63, %v125_v60  ;;  %v786_v1 = vpop.permute.xlu1 %785  ;;  %v781_v2 = vpop.permute.xlu0 %780  ;;  %v138_v60 = vld [vmem:[%s2006_s1 + $0x3f0] sm:$0xff] }
 0x186   :  { %v1011_v3 = vmul.f32 %v786_v1, %v115_v61  ;;  %v1010_v4 = vmul.f32 %v781_v2, %v114_v62 }
 0x187   :  { %1149 = vst [vmem:[#allocation2 + $0x388] sm:$0xff] %v1021_v0 }
 0x188   :  { %1139 = vst [vmem:[#allocation2 + $0x338] sm:$0xff] %v1011_v3 }
 0x189   :  { %1138 = vst [vmem:[#allocation2 + $0x330] sm:$0xff] %v1010_v4 }
 0x18c   :  { %v851_v8 = vpop.permute.xlu2 %850 }
 0x18d   :  { %v1024_v9 = vmul.f32 %v851_v8, %v128_v5  ;;  %v801_v10 = vpop.permute.xlu1 %800  ;;  %v796_v11 = vpop.permute.xlu0 %795 }
 0x18e   :  { %v1014_v12 = vmul.f32 %v801_v10, %v118_v6  ;;  %v1013_v13 = vmul.f32 %v796_v11, %v117_v7 }
 0x18f   :  { %1152 = vst [vmem:[#allocation2 + $0x3a0] sm:$0xff] %v1024_v9 }
 0x190   :  { %1142 = vst [vmem:[#allocation2 + $0x350] sm:$0xff] %v1014_v12 }
 0x191   :  { %1141 = vst [vmem:[#allocation2 + $0x348] sm:$0xff] %v1013_v13 }
 0x194   :  { %v866_v17 = vpop.permute.xlu2 %865 }
 0x195   :  { %v1027_v18 = vmul.f32 %v866_v17, %v131_v14  ;;  %v816_v19 = vpop.permute.xlu1 %815  ;;  %v811_v20 = vpop.permute.xlu0 %810 }
 0x196   :  { %v1017_v21 = vmul.f32 %v816_v19, %v121_v15  ;;  %v1016_v22 = vmul.f32 %v811_v20, %v120_v16 }
 0x197   :  { %1155 = vst [vmem:[#allocation2 + $0x3b8] sm:$0xff] %v1027_v18 }
 0x198   :  { %1145 = vst [vmem:[#allocation2 + $0x368] sm:$0xff] %v1017_v21 }
 0x199   :  { %1144 = vst [vmem:[#allocation2 + $0x360] sm:$0xff] %v1016_v22 }
 0x19c   :  { %v881_v26 = vpop.permute.xlu2 %880 }
 0x19d   :  { %v1030_v27 = vmul.f32 %v881_v26, %v134_v23  ;;  %v831_v28 = vpop.permute.xlu1 %830  ;;  %v826_v29 = vpop.permute.xlu0 %825 }
 0x19e   :  { %v1020_v30 = vmul.f32 %v831_v28, %v124_v24  ;;  %v1019_v31 = vmul.f32 %v826_v29, %v123_v25 }
 0x19f   :  { %1158 = vst [vmem:[#allocation2 + $0x3d0] sm:$0xff] %v1030_v27 }
 0x1a0   :  { %1148 = vst [vmem:[#allocation2 + $0x380] sm:$0xff] %v1020_v30 }
 0x1a1   :  { %1147 = vst [vmem:[#allocation2 + $0x378] sm:$0xff] %v1019_v31 }
 0x1a4   :  { %v896_v35 = vpop.permute.xlu2 %895 }
 0x1a5   :  { %v1033_v36 = vmul.f32 %v896_v35, %v137_v32  ;;  %v846_v37 = vpop.permute.xlu1 %845  ;;  %v841_v38 = vpop.permute.xlu0 %840 }
 0x1a6   :  { %v1023_v39 = vmul.f32 %v846_v37, %v127_v33  ;;  %v1022_v40 = vmul.f32 %v841_v38, %v126_v34 }
 0x1a7   :  { %1161 = vst [vmem:[#allocation2 + $0x3e8] sm:$0xff] %v1033_v36 }
 0x1a8   :  { %1151 = vst [vmem:[#allocation2 + $0x398] sm:$0xff] %v1023_v39 }
 0x1a9   :  { %1150 = vst [vmem:[#allocation2 + $0x390] sm:$0xff] %v1022_v40 }
 0x1ad   :  { %v861_v43 = vpop.permute.xlu1 %860  ;;  %v856_v44 = vpop.permute.xlu0 %855 }
 0x1ae   :  { %v1026_v45 = vmul.f32 %v861_v43, %v130_v41  ;;  %v1025_v46 = vmul.f32 %v856_v44, %v129_v42 }
 0x1b0   :  { %1154 = vst [vmem:[#allocation2 + $0x3b0] sm:$0xff] %v1026_v45 }
 0x1b1   :  { %1153 = vst [vmem:[#allocation2 + $0x3a8] sm:$0xff] %v1025_v46 }
 0x1b5   :  { %v876_v49 = vpop.permute.xlu1 %875  ;;  %v871_v50 = vpop.permute.xlu0 %870 }
 0x1b6   :  { %v1029_v51 = vmul.f32 %v876_v49, %v133_v47  ;;  %v1028_v52 = vmul.f32 %v871_v50, %v132_v48 }
 0x1b8   :  { %1157 = vst [vmem:[#allocation2 + $0x3c8] sm:$0xff] %v1029_v51 }
 0x1b9   :  { %1156 = vst [vmem:[#allocation2 + $0x3c0] sm:$0xff] %v1028_v52 }
 0x1bd   :  { %v891_v55 = vpop.permute.xlu1 %890  ;;  %v886_v56 = vpop.permute.xlu0 %885 }
 0x1be   :  { %v1032_v57 = vmul.f32 %v891_v55, %v136_v53  ;;  %v1031_v58 = vmul.f32 %v886_v56, %v135_v54 }
 0x1c0   :  { %1160 = vst [vmem:[#allocation2 + $0x3e0] sm:$0xff] %v1032_v57 }
 0x1c1   :  { %1159 = vst [vmem:[#allocation2 + $0x3d8] sm:$0xff] %v1031_v58 }
 0x1c5   :  { %v906_v61 = vpop.permute.xlu1 %905  ;;  %v901_v62 = vpop.permute.xlu0 %900 }
 0x1c6   :  { %v1035_v63 = vmul.f32 %v906_v61, %v139_v59  ;;  %v1034_v0 = vmul.f32 %v901_v62, %v138_v60 }
 0x1c8   :  { %1163 = vst [vmem:[#allocation2 + $0x3f8] sm:$0xff] %v1035_v63 }
 0x1c9   :  { %1162 = vst [vmem:[#allocation2 + $0x3f0] sm:$0xff] %v1034_v0 }
 0x1ca   :  { %1176 = dma.vmem_to_hbm [thread:$0]  %s1169_s15, 16384, %s1171_s18, [#allocation3], %s1217_s19, %s1217_s19, %s1218_s20  }
 0x1cb   :  { %1213 = dma.done.wait [#allocation3], 16384  }
 0x1cc   :  { %1214 = vsyncadd [#allocation3], 4294950912 }
 0x1cd   :  { %1181 = vsyncpa [#allocation3], 1 }

</bundles_post_ra>
